<compile_context>
chip_gen: v5e
topology: v5e:2x2
jax: 0.10.0
libtpu: 0.0.40
codegen_flags: <defaults>
</compile_context>

<pallas_src>
import jax
import jax.numpy as jnp
from jax.experimental import pallas as pl
from jax.experimental.pallas import tpu as pltpu

LANE = 128
DEFAULT_COMPUTE_DTYPE = jnp.bfloat16


def _round_up(v, m):
    return ((v + m - 1) // m) * m


def _sublane(dtype):
    itemsize = jnp.dtype(dtype).itemsize
    return {1: 32, 2: 16}.get(itemsize, 8)


def _pad2d(a, shape):
    pr, pc = shape[0] - a.shape[0], shape[1] - a.shape[1]
    if pr == 0 and pc == 0:
        return a
    return jnp.pad(a, ((0, pr), (0, pc)))


def _usable_vmem_bytes():
    """Generation-aware scoped-VMEM budget with headroom (v5e/v6e 128 MiB, v7x 64 MiB/TC)."""
    try:
        cap = int(pltpu.get_tpu_info().vmem_capacity_bytes)
    except Exception:  # hardware-query fallback only; 64 MiB is valid on every generation
        cap = 64 << 20
    return max((cap * 7) // 8, 32 << 20)


def autoencoder_kernel(x_ref, w1_ref, b1_ref, w2_ref, b2_ref, out_ref, acc_ref):
    """y = sum_h relu(x @ W1[:, h] + b1[h]) @ W2[h, :]  (+ b2 at the last h tile)."""
    h_idx = pl.program_id(1)

    @pl.when(h_idx == 0)
    def _():
        acc_ref[...] = jnp.zeros_like(acc_ref)

    # encoder tile: f32 MXU accumulation, f32 bias + ReLU epilogue
    hid = jnp.dot(x_ref[...], w1_ref[...], preferred_element_type=jnp.float32)
    hid = jnp.maximum(hid + b1_ref[...], 0.0)
    # decoder tile: cast back to compute dtype for the MXU, accumulate in f32 VMEM
    acc_ref[...] += jnp.dot(hid.astype(w2_ref.dtype), w2_ref[...],
                            preferred_element_type=jnp.float32)

    @pl.when(h_idx == pl.num_programs(1) - 1)
    def _():
        out_ref[...] = (acc_ref[...] + b2_ref[...]).astype(out_ref.dtype)


def prepare_params(w1, b1, w2, b2, *, compute_dtype=DEFAULT_COMPUTE_DTYPE,
                   block_h=None, block_b_hint=512):
    """Pad / cast weights ONCE (hoisted out of the per-call path) and pick the H tiling.

    Returns a dict that can be reused across many autoencoder_forward calls.
    """
    D_in, H = w1.shape
    assert w2.shape == (H, D_in), (w1.shape, w2.shape)
    cdt = jnp.dtype(compute_dtype)
    itemsize = cdt.itemsize
    Dp = _round_up(D_in, LANE)
    Hp = _round_up(H, LANE)

    # VMEM budget left for the resident / pipelined weight blocks.
    usable = _usable_vmem_bytes()
    fixed = (2 * block_b_hint * Dp * (itemsize + 4)      # x / out double buffers
             + block_b_hint * Dp * 4                     # f32 accumulator
             + (Hp + Dp) * 4 + (4 << 20))                # biases + Mosaic scratch slack
    budget = max(usable - fixed, 4 << 20)

    if block_h is None:
        nh, bh = 1, Hp
        while True:
            bufs = 1 if nh == 1 else 2                   # tiled weights are double-buffered
            if 2 * Dp * bh * itemsize * bufs <= budget or bh == LANE:
                break
            nh += 1
            bh = _round_up(pl.cdiv(Hp, nh), LANE)
        block_h = bh
    else:
        block_h = _round_up(block_h, LANE)
        nh = pl.cdiv(Hp, block_h)
    Hp_eff = nh * block_h                                # zero-padded H (inert)

    return dict(
        w1=_pad2d(jnp.asarray(w1), (Dp, Hp_eff)).astype(cdt),
        b1=_pad2d(jnp.asarray(b1).reshape(1, H), (1, Hp_eff)).astype(jnp.float32),
        w2=_pad2d(jnp.asarray(w2), (Hp_eff, Dp)).astype(cdt),
        b2=_pad2d(jnp.asarray(b2).reshape(1, D_in), (1, Dp)).astype(jnp.float32),
        D_in=D_in, H=H, Dp=Dp, Hp_eff=Hp_eff, nh=nh, block_h=block_h,
        compute_dtype=cdt,
    )


def autoencoder_forward(x, params, *, block_b=512):
    """Fused autoencoder forward on prepared (padded / cast) params."""
    cdt = params["compute_dtype"]
    D_in, Dp = params["D_in"], params["Dp"]
    Hp_eff, nh, block_h = params["Hp_eff"], params["nh"], params["block_h"]
    orig_dtype = x.dtype
    B = x.shape[0]
    assert x.shape[1] == D_in

    # --- batch tiling: sublane-packed tiles, >=2 tiles when B allows, bounded padding.
    sub = _sublane(cdt)
    bmax = max(sub, _round_up(min(block_b, B), sub))
    nb = max(1, pl.cdiv(B, bmax))
    if nb == 1 and B >= 2 * sub:
        nb = 2                       # lets v7x megacore + DMA pipelining actually engage
    block_b = _round_up(pl.cdiv(B, nb), sub)
    Bp = nb * block_b

    x_p = _pad2d(x, (Bp, Dp)).astype(cdt)

    itemsize = cdt.itemsize
    out_itemsize = jnp.dtype(orig_dtype).itemsize

    # Megacore: only shard the batch axis when activation traffic dominates weight
    # traffic -- otherwise each TC would DMA its own copy of the resident weights.
    weight_bytes = 2 * Dp * Hp_eff * itemsize
    act_bytes = Bp * Dp * itemsize
    batch_sem = "parallel" if (nb >= 2 and act_bytes >= weight_bytes) else "arbitrary"

    cost = pl.CostEstimate(
        flops=4 * Bp * Dp * Hp_eff,
        transcendentals=0,
        bytes_accessed=int(act_bytes + weight_bytes + (Hp_eff + Dp) * 4
                           + Bp * Dp * out_itemsize),
    )

    weight_bufs = 1 if nh == 1 else 2
    est = (2 * block_b * Dp * (itemsize + out_itemsize)        # x / out double buffers
           + block_b * Dp * 4                                  # f32 accumulator
           + weight_bufs * 2 * Dp * block_h * itemsize         # W1 + W2 blocks
           + (Hp_eff + Dp) * 4)                                # biases
    vmem_limit = int(min(max(est * 3 // 2, 32 << 20), _usable_vmem_bytes()))

    def const_spec(shape, index_map, single):
        if single:  # grid-constant block: no need to double-buffer
            return pl.BlockSpec(shape, index_map, pipeline_mode=pl.Buffered(1))
        return pl.BlockSpec(shape, index_map)

    def build(single):
        in_specs = [
            pl.BlockSpec((block_b, Dp), lambda i, h: (i, 0)),         # x tile
            const_spec((Dp, block_h), lambda i, h: (0, h), single),   # W1 block
            const_spec((1, block_h), lambda i, h: (0, h), single),    # b1 block
            const_spec((block_h, Dp), lambda i, h: (h, 0), single),   # W2 block
            const_spec((1, Dp), lambda i, h: (0, 0), single),         # b2
        ]
        return pl.pallas_call(
            autoencoder_kernel,
            out_shape=jax.ShapeDtypeStruct((Bp, Dp), orig_dtype),
            grid_spec=pltpu.PrefetchScalarGridSpec(
                num_scalar_prefetch=0,
                grid=(nb, nh),
                in_specs=in_specs,
                out_specs=pl.BlockSpec((block_b, Dp), lambda i, h: (i, 0)),
                scratch_shapes=[pltpu.VMEM((block_b, Dp), jnp.float32)],
            ),
            compiler_params=pltpu.CompilerParams(
                dimension_semantics=(batch_sem, "arbitrary"),
                vmem_limit_bytes=vmem_limit,
            ),
            cost_estimate=cost,
        )

    args = (x_p, params["w1"], params["b1"], params["w2"], params["b2"])
    # Buffered(1) only makes sense when weight blocks are constant across the grid.
    if nh == 1 and hasattr(pl, "Buffered"):
        try:
            out_p = build(True)(*args)
        except (TypeError, ValueError, NotImplementedError, pltpu.LoweringException):
            # pipeline_mode=pl.Buffered(1) unsupported on this jax build; identical
            # shapes with default double-buffered constant blocks (correctness same).
            out_p = build(False)(*args)
    else:
        out_p = build(False)(*args)

    return out_p[:B, :D_in]


def reference_forward(x, w1, b1, w2, b2, compute_dtype=None):
    dt = jnp.dtype(compute_dtype) if compute_dtype is not None else x.dtype
    h = jnp.dot(x.astype(dt), w1.astype(dt), preferred_element_type=jnp.float32)
    h = jnp.maximum(h + b1.astype(jnp.float32), 0.0)
    y = jnp.dot(h.astype(dt), w2.astype(dt), preferred_element_type=jnp.float32)
    return (y + b2.astype(jnp.float32)).astype(x.dtype)


if __name__ == "__main__":
    key = jax.random.PRNGKey(0)
    k_x, k_w1, k_b1, k_w2, k_b2 = jax.random.split(key, 5)

    # --- Test 1: default bf16 MXU compute, lane-aligned dims, resident (nh=1) weights.
    B, D_in, H = 32, 256, 128
    x = jax.random.normal(k_x, (B, D_in), dtype=jnp.float32)
    w1 = jax.random.normal(k_w1, (D_in, H), dtype=jnp.float32) * 0.1
    b1 = jax.random.normal(k_b1, (H,), dtype=jnp.float32) * 0.1
    w2 = jax.random.normal(k_w2, (H, D_in), dtype=jnp.float32) * 0.1
    b2 = jax.random.normal(k_b2, (D_in,), dtype=jnp.float32) * 0.1

    params = prepare_params(w1, b1, w2, b2)        # pad/cast hoisted; reuse across calls
    out = jax.block_until_ready(autoencoder_forward(x, params))
    ref = reference_forward(x, w1, b1, w2, b2, compute_dtype=jnp.bfloat16)
    assert out.shape == (B, D_in)
    assert jnp.allclose(out, ref, atol=5e-2, rtol=5e-2), \
        float(jnp.max(jnp.abs(out - ref)))

    # --- Test 2: f32 compute, ragged/unaligned shapes, forced H-tiled accumulator path.
    Bu, Du, Hu = 10, 200, 256
    xu = jax.random.normal(k_x, (Bu, Du), dtype=jnp.float32)
    w1u = jax.random.normal(k_w1, (Du, Hu), dtype=jnp.float32) * 0.1
    b1u = jax.random.normal(k_b1, (Hu,), dtype=jnp.float32) * 0.1
    w2u = jax.random.normal(k_w2, (Hu, Du), dtype=jnp.float32) * 0.1
    b2u = jax.random.normal(k_b2, (Du,), dtype=jnp.float32) * 0.1

    params_u = prepare_params(w1u, b1u, w2u, b2u,
                              compute_dtype=jnp.float32, block_h=128)
    assert params_u["nh"] == 2                     # exercises the accumulator path
    out_u = jax.block_until_ready(autoencoder_forward(xu, params_u))
    ref_u = reference_forward(xu, w1u, b1u, w2u, b2u, compute_dtype=jnp.float32)
    assert out_u.shape == (Bu, Du)
    assert jnp.allclose(out_u, ref_u, atol=5e-3, rtol=5e-3), \
        float(jnp.max(jnp.abs(out_u - ref_u)))

    print("KERNEL_OK")
</pallas_src>

<mosaic_0001>
module attributes {stable_mosaic.version = 11 : i64} {
  func.func @autoencoder_kernel(%arg0: i32, %arg1: i32, %arg2: memref<16x256xbf16, #tpu.memory_space<vmem>>, %arg3: memref<256x128xbf16, #tpu.memory_space<vmem>>, %arg4: memref<1x128xf32, #tpu.memory_space<vmem>>, %arg5: memref<128x256xbf16, #tpu.memory_space<vmem>>, %arg6: memref<1x256xf32, #tpu.memory_space<vmem>>, %arg7: memref<16x256xf32, #tpu.memory_space<vmem>>, %arg8: memref<16x256xf32, #tpu.memory_space<vmem>>) attributes {dimension_semantics = [#tpu.dimension_semantics<arbitrary>, #tpu.dimension_semantics<arbitrary>], iteration_bounds = array<i64: 2, 1>, scalar_prefetch = 0 : i64, scratch_operands = 1 : i64, tpu.core_type = #tpu.core_type<tc>, window_params = [{transform_indices = @transform_0, window_bounds = array<i64: 16, 256>}, {pipeline_mode = #tpu.pipeline_mode<synchronous>, transform_indices = @transform_1, window_bounds = array<i64: 256, 128>}, {pipeline_mode = #tpu.pipeline_mode<synchronous>, transform_indices = @transform_2, window_bounds = array<i64: 1, 128>}, {pipeline_mode = #tpu.pipeline_mode<synchronous>, transform_indices = @transform_3, window_bounds = array<i64: 128, 256>}, {pipeline_mode = #tpu.pipeline_mode<synchronous>, transform_indices = @transform_4, window_bounds = array<i64: 1, 256>}, {transform_indices = @transform_5, window_bounds = array<i64: 16, 256>}]} {
    %c0_i32 = arith.constant 0 : i32
    %0 = arith.cmpi eq, %arg1, %c0_i32 : i32
    %1 = arith.extui %0 : i1 to i32
    %c0_i32_0 = arith.constant 0 : i32
    %2 = arith.cmpi ne, %1, %c0_i32_0 : i32
    scf.if %2 {
      %cst_16 = arith.constant 0.000000e+00 : f32
      %20 = vector.broadcast %cst_16 : f32 to vector<16x256xf32>
      %c0_17 = arith.constant 0 : index
      %c0_18 = arith.constant 0 : index
      %21 = vector.load %arg8[%c0_17, %c0_18] : memref<16x256xf32, #tpu.memory_space<vmem>>, vector<16x256xf32>
      tpu.vector_store %arg8[%c0_17, %c0_18], %20 {strides = array<i32>} : memref<16x256xf32, #tpu.memory_space<vmem>>, vector<16x256xf32>,
    } else {
    }
    %c0 = arith.constant 0 : index
    %c0_1 = arith.constant 0 : index
    %3 = vector.load %arg2[%c0, %c0_1] : memref<16x256xbf16, #tpu.memory_space<vmem>>, vector<16x256xbf16>
    %c0_2 = arith.constant 0 : index
    %c0_3 = arith.constant 0 : index
    %4 = vector.load %arg3[%c0_2, %c0_3] : memref<256x128xbf16, #tpu.memory_space<vmem>>, vector<256x128xbf16>
    %cst = arith.constant dense<0.000000e+00> : vector<16x128xf32>
    %5 = tpu.matmul %3, %4, %cst {dimension_numbers = #tpu.dot_dimension_numbers<[1], [0], [0], [1], [0, 0, 1, 1], [], []>} : vector<16x256xbf16>, vector<256x128xbf16>, vector<16x128xf32> -> vector<16x128xf32>
    %c0_4 = arith.constant 0 : index
    %c0_5 = arith.constant 0 : index
    %6 = vector.load %arg4[%c0_4, %c0_5] : memref<1x128xf32, #tpu.memory_space<vmem>>, vector<1x128xf32>
    %7 = vector.broadcast %6 : vector<1x128xf32> to vector<16x128xf32>
    %8 = arith.addf %5, %7 : vector<16x128xf32>
    %cst_6 = arith.constant 0.000000e+00 : f32
    %9 = vector.broadcast %cst_6 : f32 to vector<16x128xf32>
    %10 = arith.maximumf %8, %9 : vector<16x128xf32>
    %c0_7 = arith.constant 0 : index
    %c0_8 = arith.constant 0 : index
    %11 = vector.load %arg8[%c0_7, %c0_8] : memref<16x256xf32, #tpu.memory_space<vmem>>, vector<16x256xf32>
    %12 = arith.truncf %10 : vector<16x128xf32> to vector<16x128xbf16>
    %c0_9 = arith.constant 0 : index
    %c0_10 = arith.constant 0 : index
    %13 = vector.load %arg5[%c0_9, %c0_10] : memref<128x256xbf16, #tpu.memory_space<vmem>>, vector<128x256xbf16>
    %cst_11 = arith.constant dense<0.000000e+00> : vector<16x256xf32>
    %14 = tpu.matmul %12, %13, %cst_11 {dimension_numbers = #tpu.dot_dimension_numbers<[1], [0], [0], [1], [0, 0, 1, 1], [], []>} : vector<16x128xbf16>, vector<128x256xbf16>, vector<16x256xf32> -> vector<16x256xf32>
    %15 = arith.addf %11, %14 : vector<16x256xf32>
    %c0_12 = arith.constant 0 : index
    %c0_13 = arith.constant 0 : index
    %16 = vector.load %arg8[%c0_12, %c0_13] : memref<16x256xf32, #tpu.memory_space<vmem>>, vector<16x256xf32>
    tpu.vector_store %arg8[%c0_12, %c0_13], %15 {strides = array<i32>} : memref<16x256xf32, #tpu.memory_space<vmem>>, vector<16x256xf32>,
    %c0_i32_14 = arith.constant 0 : i32
    %17 = arith.cmpi eq, %arg1, %c0_i32_14 : i32
    %18 = arith.extui %17 : i1 to i32
    %c0_i32_15 = arith.constant 0 : i32
    %19 = arith.cmpi ne, %18, %c0_i32_15 : i32
    scf.if %19 {
      %c0_16 = arith.constant 0 : index
      %c0_17 = arith.constant 0 : index
      %20 = vector.load %arg8[%c0_16, %c0_17] : memref<16x256xf32, #tpu.memory_space<vmem>>, vector<16x256xf32>
      %c0_18 = arith.constant 0 : index
      %c0_19 = arith.constant 0 : index
      %21 = vector.load %arg6[%c0_18, %c0_19] : memref<1x256xf32, #tpu.memory_space<vmem>>, vector<1x256xf32>
      %22 = vector.broadcast %21 : vector<1x256xf32> to vector<16x256xf32>
      %23 = arith.addf %20, %22 : vector<16x256xf32>
      %c0_20 = arith.constant 0 : index
      %c0_21 = arith.constant 0 : index
      %24 = vector.load %arg7[%c0_20, %c0_21] : memref<16x256xf32, #tpu.memory_space<vmem>>, vector<16x256xf32>
      tpu.vector_store %arg7[%c0_20, %c0_21], %23 {strides = array<i32>} : memref<16x256xf32, #tpu.memory_space<vmem>>, vector<16x256xf32>,
    } else {
    }
    return
  }
  func.func @transform_0(%arg0: i32, %arg1: i32) -> (i32, i32) {
    %c0_i32 = arith.constant 0 : i32
    %c0_i32_0 = arith.constant 0 : i32
    return %arg0, %c0_i32 : i32, i32
  }
  func.func @transform_1(%arg0: i32, %arg1: i32) -> (i32, i32) {
    %c0_i32 = arith.constant 0 : i32
    %c0_i32_0 = arith.constant 0 : i32
    return %c0_i32, %arg1 : i32, i32
  }
  func.func @transform_2(%arg0: i32, %arg1: i32) -> (i32, i32) {
    %c0_i32 = arith.constant 0 : i32
    %c0_i32_0 = arith.constant 0 : i32
    return %c0_i32, %arg1 : i32, i32
  }
  func.func @transform_3(%arg0: i32, %arg1: i32) -> (i32, i32) {
    %c0_i32 = arith.constant 0 : i32
    %c0_i32_0 = arith.constant 0 : i32
    return %arg1, %c0_i32 : i32, i32
  }
  func.func @transform_4(%arg0: i32, %arg1: i32) -> (i32, i32) {
    %c0_i32 = arith.constant 0 : i32
    %c0_i32_0 = arith.constant 0 : i32
    %c0_i32_1 = arith.constant 0 : i32
    return %c0_i32, %c0_i32_0 : i32, i32
  }
  func.func @transform_5(%arg0: i32, %arg1: i32) -> (i32, i32) {
    %c0_i32 = arith.constant 0 : i32
    %c0_i32_0 = arith.constant 0 : i32
    return %arg0, %c0_i32 : i32, i32
  }
}

</mosaic_0001>

<bundles_post_ra>
// kernel: tpu_custom_call.1
= control target key start
LH: loop header
LB: loop body
LE: loop exit
PB: predicated region body
PF: predicated region fallthrough
CT: control target
= control target key end

     0   :  { %s1464_s0 = inlined_call_operand.hbm [shape: bf16[32,256], index: 0, kind: input, shape index: {}]   ;;  %s1465_s1 = inlined_call_operand.hbm [shape: bf16[256,128], index: 1, kind: input, shape index: {}]   ;;  %s1466_s2 = inlined_call_operand.vmem [shape: f32[1,128], index: 2, kind: input, shape index: {}]   ;;  %s1467_s3 = inlined_call_operand.hbm [shape: bf16[128,256], index: 3, kind: input, shape index: {}]   ;;  %s1468_s4 = inlined_call_operand.vmem [shape: f32[1,256], index: 4, kind: input, shape index: {}]   ;;  %s1469_s5 = inlined_call_operand.hbm [shape: f32[32,256], index: 5, kind: output, shape index: {}]  }
   0x1   :  { %1472 = sst [smem:[#allocation13_spill]] %s1465_s1 }
   0x2   :  { %1473 = sst [smem:[#allocation14_spill]] %s1467_s3 }
   0x3   :  { %10 = vsyncpa [#allocation4], 0 }
   0x4   :  { %12 = vsyncpa [#allocation4 + $0x1], 0 }
   0x5   :  { %13 = vsyncpa [#allocation7], 0 }
   0x6   :  { %14 = vsyncpa [#allocation5], 0 }
   0x7   :  { %16 = vsyncpa [#allocation5 + $0x1], 0  ;;  %s1299_s18 = smov 0   ;;  %s1301_s19 = smov 0  }
   0x8   :  { %s1303_s20 = smov 0   ;;  %s1305_s21 = smov 0  }
   0x9   :  { %s1307_s22 = smov 0   ;;  %s1309_s23 = smov 0  }
   0xa LB: > { %s797_s24 = sadd.s32 4294967295, %s1259_s23   ;;  %s798_s25 = sadd.s32 4294967294, %s1259_s23   ;;  %s1259_s23 = sphi %s1309_s23, %s22_s23   ;;  %s1255_s22 = sphi %s1307_s22, %s1487_s22   ;;  %s1251_s21 = sphi %s1305_s21, %s1486_s21   ;;  %s1247_s20 = sphi %s1303_s20, %s1485_s20   ;;  %s1243_s19 = sphi %s1301_s19, %s1484_s19   ;;  %s1239_s18 = sphi %s1299_s18, %s1483_s18  }
   0xb   : > { %p54_p0 = scmp.ne.s32.totalorder %s1243_s19, %s1239_s18  ;;  %p1335_p1 = scmp.eq.s32.totalorder %s797_s24, 0 }
   0xc   : > { %p183_p2 = scmp.eq.s32.totalorder %s798_s25, 1  ;;  %p799_p4 = scmp.ge.s32.totalorder %s1259_s23, 1 }
   0xd   : > { %p1341_p3 = por %p1335_p1, %p54_p0  ;;  %p190_p6 = scmp.lt.s32.totalorder %s1259_s23, 3 }
   0xe   : > { %p1346_p5 = por %p183_p2, %p54_p0  ;;  %s1477_s1 = sld [smem:[#allocation13_spill]] }
   0xf   : > { %p1354_p7 = pnand %p799_p4, %p190_p6  ;;  %s1261_s8 = smov [#allocation6]  }
  0x10   : > { %s205_s9 = sshll.u32 %s1261_s8, 4  ;;  %p803_p10 = scmp.ge.s32.totalorder %s1259_s23, 2  ;;  %s206_s9 = int_to_ptr.vmem [resolvable:$true] %s205_s9 }
  0x11   : > { %p1005_p8 = pneg %p1354_p7  ;;  %s1479_s3 = sld [smem:[#allocation14_spill]] }
  0x12   : > { %s1262_s13 = smov 64   ;;  %s1263_s14 = smov 4  }
  0x13   : > { %p1006_p9 = pnand %p1005_p8, %p1335_p1  ;;  %s1264_s15 = smov [#allocation8]  }
  0x14   : > { %s203_s6 = sshll.u32 %s1477_s1, 4  ;;  %s229_s16 = sshll.u32 %s1264_s15, 4  ;;  %s204_s6 = int_to_ptr.hbm [resolvable:$true] %s203_s6  ;;  %s230_s16 = int_to_ptr.vmem [resolvable:$true] %s229_s16 }
  0x15   : > { %1008 = dma.hbm_to_vmem [thread:$0]  (!%p1006_p9), %s204_s6, 2048, %s206_s9, [#allocation7], %s1262_s13, %s1262_s13, %s1263_s14  }
  0x16   : > { %s1470_s17 = smov 128   ;;  %s1471_s25 = smov 8  }
  0x17   : > { %s227_s12 = sshll.u32 %s1479_s3, 4  ;;  %p177_p11 = scmp.eq.s32.totalorder %s797_s24, 1  ;;  %s228_s12 = int_to_ptr.hbm [resolvable:$true] %s227_s12 }
  0x18   : > { %1011 = dma.hbm_to_vmem [thread:$0]  (!%p1006_p9), %s228_s12, 2048, %s230_s16, [#allocation7], %s1470_s17, %s1470_s17, %s1471_s25  }
  0x19   : > { %s34_s29 = sadd.s32 1, %s1255_s22  ;;  %s41_s30 = sadd.s32 1, %s1247_s20 }
  0x1a   : > { %p36_p12 = scmp.ge.s32.totalorder %s34_s29, 2  ;;  %p48_p13 = scmp.ne.s32.totalorder %s1247_s20, %s1243_s19 }
  0x1b   : > { %p49_p0 = scmp.eq.s32.totalorder %s1259_s23, 0  ;;  %p1022_p4 = scmp.lt.s32.totalorder %s1259_s23, 2 }
  0x1c   : > { %s1489_s29 = smov (%p36_p12, %s34_s29), 0  ;;  %p1378_p2 = por %p177_p11, %p48_p13 }
  0x1d   : > { %s38_s8 = ssub.s32 %s1255_s22, %s1489_s29  ;;  %s246_s9 = sand.u32 1, %s1247_s20  }
  0x1e   : > { %p39_p6 = scmp.eq.s32.totalorder %s38_s8, 0  ;;  %p50_p8 = por %p49_p0, %p48_p13 }
  0x1f   : > { %s804_s10 = sshll.u32 %s246_s9, 4  ;;  %s956_s24 = sshll.u32 %s1255_s22, 4 }
  0x20   : > { %s1388_s11 = scalar_select %p39_p6, %s1247_s20, %s41_s30  }
  0x21   : > { %s256_s14 = scalar_lea.hbm %s1464_s0, %s956_s24  ;;  %s250_s16 = scalar_lea.vmem [#allocation3], %s804_s10 }
  0x22   : > { %s257_s15 = sshll.u32 %s256_s14, 4  ;;  %s259_s17 = sshll.u32 %s250_s16, 4  ;;  %s258_s15 = int_to_ptr.hbm [resolvable:$true] %s257_s15  ;;  %s260_s17 = int_to_ptr.vmem [resolvable:$true] %s259_s17 }
  0x23   : > { %p1013_p9 = pnand %p1022_p4, %p50_p8  ;;  %s247_s25 = scalar_lea.sflag [#allocation4], %s246_s9 }
  0x24   : > { %s1481_s1 = smov 8   ;;  %s1482_s3 = smov 128  }
  0x25   : > { %1015 = dma.hbm_to_vmem [thread:$0]  (!%p1013_p9), %s258_s15, 256, %s260_s17, %s247_s25, %s1482_s3, %s1482_s3, %s1481_s1  }
  0x26   : > { %271 = sbr.rel (%p1354_p7) target bundleno = 367 (0x16f), region = 40  ;;  %s1401_s30 = sand.u32 (!%p1354_p7), 1, %s1243_s19  }
  0x27   : > { %s809_s8 = sshll.u32 (!%p1354_p7), %s1401_s30, 4  ;;  %s274_s10 = scalar_lea.sflag (!%p1354_p7), [#allocation4], %s1401_s30 }
  0x28   : > { %s1405_s24 = scalar_lea.vmem (!%p1354_p7), [#allocation3], %s809_s8 }
  0x2b   : > { %1226 = dma.done.wait (%p1341_p3), %s274_s10, 256  }
  0x2c   : > { %1228 = vsyncadd (%p1341_p3), %s274_s10, 4294967040 }
  0x2d   : > { %1230 = dma.done.wait (%p1335_p1), [#allocation7], 4096  }
  0x2e   : > { %1232 = vsyncadd (%p1335_p1), [#allocation7], 4294963200  ;;  %v966_v0 = vld [vmem:[#allocation6 + $0x38] sm:$0xff]  ;;  %v965_v2 = vld [vmem:[#allocation6 + $0x30] sm:$0xff]  ;;  %s812_s7 = sshll.u32 %s1401_s30, 5  ;;  %s992_s17 = sshll.u32 %s1251_s21, 5 }
  0x2f   : > { %v974_v1 = vld [vmem:[#allocation6 + $0x78] sm:$0xff]  ;;  %476 = vmatpush.bf16.msra.mxu0 %v966_v0  ;;  %v973_v3 = vld [vmem:[#allocation6 + $0x70] sm:$0xff]  ;;  %v964_v4 = vld [vmem:[#allocation6 + $0x28] sm:$0xff]  ;;  %s317_s25 = scalar_lea.vmem [#allocation9], %s812_s7  ;;  %s677_s13 = scalar_lea.hbm %s1469_s5, %s992_s17 }
  0x30   : > { %490 = vmatpush.bf16.msra.mxu1 %v974_v1  ;;  %v972_v5 = vld [vmem:[#allocation6 + $0x68] sm:$0xff]  ;;  %v943_v6 = vld [vmem:[#allocation8 + $0x70] sm:$0xf]  ;;  %v990_v7 = vld [vmem:[#allocation8 + $0x74] sm:$0xf0]  ;;  %s678_s14 = sshll.u32 %s317_s25, 4  ;;  %s679_s14 = int_to_ptr.vmem [resolvable:$true] %s678_s14 }
  0x31   : > { %v989_v8 = vld [vmem:[#allocation8 + $0x74] sm:$0xf]  ;;  %v945_v9 = vld [vmem:[#allocation8 + $0x78] sm:$0xf0]  ;;  %v944_v10 = vor.u32 %v990_v7, %v943_v6  ;;  %v935_v12 = vld [vmem:[#allocation8 + $0x60] sm:$0xf] }
  0x32   : > { %v948_v11 = vor.u32 %v989_v8, %v945_v9  ;;  %v988_v13 = vld [vmem:[#allocation8 + $0x64] sm:$0xf0]  ;;  %v987_v14 = vld [vmem:[#allocation8 + $0x64] sm:$0xf]  ;;  %v937_v15 = vld [vmem:[#allocation8 + $0x68] sm:$0xf0] }
  0x33   : > { %477 = vmatpush.bf16.msra.mxu0 %v965_v2  ;;  %v963_v16 = vld [vmem:[#allocation6 + $0x20] sm:$0xff]  ;;  %607 = vmatpush.bf16.msra.mxu2 %v944_v10  ;;  %v936_v18 = vor.u32 %v988_v13, %v935_v12  ;;  %v940_v19 = vor.u32 %v987_v14, %v937_v15  ;;  %v927_v20 = vld [vmem:[#allocation8 + $0x50] sm:$0xf]  ;;  %v986_v21 = vld [vmem:[#allocation8 + $0x54] sm:$0xf0]  ;;  %s680_s15 = sshll.u32 %s677_s13, 4  ;;  %s681_s15 = int_to_ptr.hbm [resolvable:$true] %s680_s15 }
  0x34   : > { %491 = vmatpush.bf16.msra.mxu1 %v973_v3  ;;  %v971_v17 = vld [vmem:[#allocation6 + $0x60] sm:$0xff]  ;;  %621 = vmatpush.bf16.msra.mxu3 %v948_v11  ;;  %v985_v22 = vld [vmem:[#allocation8 + $0x54] sm:$0xf]  ;;  %v929_v23 = vld [vmem:[#allocation8 + $0x58] sm:$0xf0]  ;;  %v928_v26 = vor.u32 %v986_v21, %v927_v20  ;;  %s665_s21 = scalar_lea.sflag [#allocation5], %s1401_s30 }
  0x35   : > { %v962_v24 = vld [vmem:[#allocation6 + $0x18] sm:$0xff]  ;;  %v932_v27 = vor.u32 %v985_v22, %v929_v23  ;;  %v919_v28 = vld [vmem:[#allocation8 + $0x40] sm:$0xf]  ;;  %v984_v29 = vld [vmem:[#allocation8 + $0x44] sm:$0xf0]  ;;  %s1187_s16 = sshra.s32 %s681_s15, 4  ;;  %s1188_s16 = int_to_ptr.hbm [resolvable:$true] %s1187_s16 }
  0x36   : > { %v970_v25 = vld [vmem:[#allocation6 + $0x58] sm:$0xff]  ;;  %v983_v30 = vld [vmem:[#allocation8 + $0x44] sm:$0xf]  ;;  %v921_v31 = vld [vmem:[#allocation8 + $0x48] sm:$0xf0]  ;;  %v920_v34 = vor.u32 %v984_v29, %v919_v28  ;;  %s1189_s8 = scalar_lea.hbm %s1188_s16, 32  ;;  %p1194_p11 = scmp.lt.s32.totalorder %s1188_s16, %s1469_s5 }
  0x37   : > { %478 = vmatpush.bf16.msra.mxu0 %v964_v4  ;;  %608 = vmatpush.bf16.msra.mxu2 %v936_v18  ;;  %v961_v32 = vld [vmem:[#allocation6 + $0x10] sm:$0xff]  ;;  %v924_v35 = vor.u32 %v983_v30, %v921_v31  ;;  %v960_v36 = vld [vmem:[#allocation6 + $0x8] sm:$0xff]  ;;  %v959_v38 = vld [vmem:[#allocation6] sm:$0xff]  ;;  %p1190_p1 = scmp.ne.s32.totalorder %s1188_s16, %s1189_s8  ;;  %s1193_s1 = scalar_lea.hbm %s1469_s5, 64 }
  0x38   : > { %492 = vmatpush.bf16.msra.mxu1 %v972_v5  ;;  %622 = vmatpush.bf16.msra.mxu3 %v940_v19  ;;  %v969_v33 = vld [vmem:[#allocation6 + $0x50] sm:$0xff]  ;;  %v968_v37 = vld [vmem:[#allocation6 + $0x48] sm:$0xff]  ;;  %v967_v39 = vld [vmem:[#allocation6 + $0x40] sm:$0xff]  ;;  %p1195_p12 = scmp.lt.s32.totalorder %s1193_s1, %s1189_s8 }
  0x39   : > { %v815_v40 = vld [vmem:[%s1405_s24] sm:$0xf]  ;;  %v958_v41 = vld [vmem:[%s1405_s24 + $0x4] sm:$0xf0]  ;;  %v957_v42 = vld [vmem:[%s1405_s24 + $0x4] sm:$0xf]  ;;  %p1191_p3 = pnand %p1190_p1, %p1378_p2 }
  0x3a   : > { %v817_v43 = vld [vmem:[%s1405_s24 + $0x8] sm:$0xf0]  ;;  %v816_v44 = vor.u32 %v958_v41, %v815_v40  ;;  %v911_v46 = vld [vmem:[#allocation8 + $0x30] sm:$0xf]  ;;  %v982_v47 = vld [vmem:[#allocation8 + $0x34] sm:$0xf0]  ;;  %p1196_p13 = por %p1195_p12, %p1194_p11 }
  0x3b   : > { %479 = vmatpush.bf16.msra.mxu0 %v963_v16  ;;  %609 = vmatpush.bf16.msra.mxu2 %v928_v26  ;;  %v820_v45 = vor.u32 %v957_v42, %v817_v43  ;;  %v981_v48 = vld [vmem:[#allocation8 + $0x34] sm:$0xf]  ;;  %v912_v49 = vor.u32 %v982_v47, %v911_v46  ;;  %v913_v50 = vld [vmem:[#allocation8 + $0x38] sm:$0xf0]  ;;  %v903_v52 = vld [vmem:[#allocation8 + $0x20] sm:$0xf]  ;;  %p1192_p7 = pneg %p1191_p3 }
  0x3c   : > { %493 = vmatpush.bf16.msra.mxu1 %v971_v17  ;;  %623 = vmatpush.bf16.msra.mxu3 %v932_v27  ;;  %v916_v51 = vor.u32 %v981_v48, %v913_v50  ;;  %v980_v53 = vld [vmem:[#allocation8 + $0x24] sm:$0xf0]  ;;  %v979_v54 = vld [vmem:[#allocation8 + $0x24] sm:$0xf]  ;;  %v905_v56 = vld [vmem:[#allocation8 + $0x28] sm:$0xf0] }
  0x3d   : > { %v904_v55 = vor.u32 %v980_v53, %v903_v52  ;;  %v908_v57 = vor.u32 %v979_v54, %v905_v56  ;;  %v895_v58 = vld [vmem:[#allocation8 + $0x10] sm:$0xf]  ;;  %v978_v59 = vld [vmem:[#allocation8 + $0x14] sm:$0xf0]  ;;  %v977_v60 = vld [vmem:[#allocation8 + $0x14] sm:$0xf]  ;;  %p1197_p0 = pnand %p1196_p13, %p1192_p7 }
  0x3e   : > { %v896_v61 = vor.u32 %v978_v59, %v895_v58  ;;  %v897_v62 = vld [vmem:[#allocation8 + $0x18] sm:$0xf0]  ;;  %v887_v0 = vld [vmem:[#allocation8] sm:$0xf]  ;;  %v976_v1 = vld [vmem:[#allocation8 + $0x4] sm:$0xf0] }
  0x3f   : > { %480 = vmatpush.bf16.msra.mxu0 %v962_v24  ;;  %610 = vmatpush.bf16.msra.mxu2 %v920_v34  ;;  %v900_v63 = vor.u32 %v977_v60, %v897_v62  ;;  %v975_v2 = vld [vmem:[#allocation8 + $0x4] sm:$0xf]  ;;  %v888_v3 = vor.u32 %v976_v1, %v887_v0  ;;  %v889_v4 = vld [vmem:[#allocation8 + $0x8] sm:$0xf0]  ;;  %v1082_v8 = vld [vmem:[%s1466_s2] ss:$0 sm:$0xff] }
  0x40   : > { %494 = vmatpush.bf16.msra.mxu1 %v970_v25  ;;  %624 = vmatpush.bf16.msra.mxu3 %v924_v35  ;;  %v892_v5 = vor.u32 %v975_v2, %v889_v4  ;;  %v650_v18 = vld [vmem:[%s1468_s4] sm:$0x3] }
  0x41   : > { %v652_v19 = vperm.slane %v650_v18, 0  ;;  %v653_v20 = vperm.slane %v650_v18, 1 }
  0x43   : > { %481 = vmatpush.bf16.msra.mxu0 %v961_v32  ;;  %611 = vmatpush.bf16.msra.mxu2 %v912_v49 }
  0x44   : > { %495 = vmatpush.bf16.msra.mxu1 %v969_v33  ;;  %625 = vmatpush.bf16.msra.mxu3 %v916_v51 }
  0x47   : > { %482 = vmatpush.bf16.msra.mxu0 %v960_v36  ;;  %612 = vmatpush.bf16.msra.mxu2 %v904_v55 }
  0x48   : > { %496 = vmatpush.bf16.msra.mxu1 %v968_v37  ;;  %626 = vmatpush.bf16.msra.mxu3 %v908_v57 }
  0x4b   : > { %483 = vmatpush.bf16.msra.mxu0 %v959_v38  ;;  %613 = vmatpush.bf16.msra.mxu2 %v896_v61 }
  0x4c   : > { %497 = vmatpush.bf16.msra.mxu1 %v967_v39  ;;  %627 = vmatpush.bf16.msra.mxu3 %v900_v63 }
  0x4e   : > { %484 = vmatmul.bf16.vlgmr.msra.gmra.mxu0 %v816_v44 }
  0x4f   : > { %498 = vmatmul.bf16.vlgmr.msra.gmra.mxu1 %v820_v45  ;;  %614 = vmatpush.bf16.msra.mxu2 %v888_v3 }
  0x50   : > { %628 = vmatpush.bf16.msra.mxu3 %v892_v5 }
  0xcb   : > { %v485_v6 = vpop.f32.mrf.mxu0 }
  0xcc   : > { %v499_v7 = vpop.f32.mrf.mxu1  ;;  %v486_v9 = vadd.f32 %v1082_v8, %v485_v6 }
  0xce   : > { %v500_v11 = vadd.f32 %v499_v7, %v486_v9 }
  0xd0   : > { %v504_v15 = vmax.f32 %v500_v11, 0.0 }
  0xd3   : > { %v487_v10 = vpop.f32.mrf.mxu0 }
  0xd4   : > { %v488_v12 = vadd.f32 %v1082_v8, %v487_v10  ;;  %v501_v13 = vpop.f32.mrf.mxu1 }
  0xd6   : > { %v502_v14 = vadd.f32 %v501_v13, %v488_v12 }
  0xd8   : > { %v505_v16 = vmax.f32 %v502_v14, 0.0 }
  0xda   : > { %v510_v17 = vpack.c.bf16 %v505_v16, %v504_v15 }
  0xdc   : > { %615 = vmatmul.bf16.vlgmr.msra.gmra.mxu2 %v510_v17  ;;  %629 = vmatmul.bf16.vlgmr.msra.gmra.mxu3 %v510_v17 }
 0x15f   : > { %v616_v21 = vpop.f32.mrf.mxu2  ;;  %v630_v22 = vpop.f32.mrf.mxu3 }
 0x160   : > { %v656_v23 = vadd.f32 %v652_v19, %v616_v21  ;;  %v657_v24 = vadd.f32 %v653_v20, %v630_v22 }
 0x162   : > { %660 = vst [vmem:[%s317_s25] sm:$0xff] %v656_v23 }
 0x163   : > { %661 = vst [vmem:[%s317_s25 + $0x8] sm:$0xff] %v657_v24 }
 0x167   : > { %v618_v25 = vpop.f32.mrf.mxu2  ;;  %v632_v26 = vpop.f32.mrf.mxu3 }
 0x168   : > { %v658_v27 = vadd.f32 %v652_v19, %v618_v25  ;;  %v659_v28 = vadd.f32 %v653_v20, %v632_v26 }
 0x16a   : > { %662 = vst [vmem:[%s317_s25 + $0x10] sm:$0xff] %v658_v27 }
 0x16b   : > { %663 = vst [vmem:[%s317_s25 + $0x18] sm:$0xff] %v659_v28 }
 0x16c   : > { %1200 = shalt.err (!%p1197_p0)
}
 0x16d   : > { %s1267_s30 = smov 256   ;;  %s1268_s27 = smov 16  }
 0x16e   : > { %1003 = dma.vmem_to_hbm [thread:$0]  (%p1378_p2), %s679_s14, 512, %s681_s15, %s665_s21, %s1267_s30, %s1267_s30, %s1268_s27  }
 0x16f PF: > { %s695_s7 = sand.u32 1, %s1239_s18   ;;  %p1017_p4 = pnand %p803_p10, %p1346_p5 }
 0x170   : > { %s696_s17 = scalar_lea.sflag [#allocation5], %s695_s7 }
 0x171   : > { %p1018_p6 = pneg %p1017_p4 }
 0x173   : > { %1234 = dma.done.wait (%p1018_p6), %s696_s17, 512  }
 0x174   : > { %1236 = vsyncadd (%p1018_p6), %s696_s17, 4294966784  ;;  %s22_s23 = sadd.s32 1, %s1259_s23   ;;  %s1483_s18 = smov %s1243_s19 }
 0x175   : > { %p19_p8 = scmp.ge.s32.totalorder %s22_s23, 4   ;;  %s1484_s19 = smov %s1247_s20 }
 0x176   : > { %s1485_s20 = smov %s1388_s11  ;;  %s1486_s21 = smov %s1255_s22 }
 0x177   : > { %s1487_s22 = smov %s1489_s29  ;;  %21 = sbr.rel (!%p19_p8) target bundleno = 10 (0xa), region = 106 }
 0x17c   :  { %702 = vsyncpa [#allocation4], 1 }
 0x17d   :  { %704 = vsyncpa [#allocation4 + $0x1], 1 }
 0x17e   :  { %705 = vsyncpa [#allocation7], 1 }
 0x17f   :  { %706 = vsyncpa [#allocation5], 1 }
 0x180   :  { %708 = vsyncpa [#allocation5 + $0x1], 1 }

</bundles_post_ra>
